<compile_context>
chip_gen: v7x
topology: tpu7x:2x2x1
jax: 0.10.0
libtpu: 0.0.40
codegen_flags: <defaults>
</compile_context>

<pallas_src>
import functools

import jax
import jax.numpy as jnp
from jax.experimental import pallas as pl
from jax.experimental.pallas import tpu as pltpu


def _se_kernel(x_ref, *rest, rescale_input, hw):
    # x_ref : (1, C, HWp)   native dtype
    # mask  : (1, 1, HWp)   only present when rescale_input=True
    # w1    : (C//r, C)     PyTorch nn.Linear layout (out, in)
    # w2    : (C, C//r)
    # o_ref : (1, C, HWp)   native dtype
    if rescale_input:
        mask_ref, w1_ref, w2_ref, o_ref = rest
    else:
        w1_ref, w2_ref, o_ref = rest

    # ---- squeeze: spatial reduction, accumulated in f32 ----
    xsum = jnp.sum(x_ref[...].astype(jnp.float32), axis=-1)            # (1, C)
    if rescale_input:
        msum = jnp.sum(mask_ref[...].astype(jnp.float32), axis=-1)     # (1, 1)
        y = xsum / msum                                                # (1, C)
    else:
        y = xsum / jnp.float32(hw)                                     # mean

    # ---- excitation: Linear -> ReLU -> Linear -> Sigmoid (bias-free) ----
    w1 = w1_ref[...].astype(jnp.float32)                               # (Ch, C)
    w2 = w2_ref[...].astype(jnp.float32)                               # (C, Ch)
    # contract over the "in" dim of each PyTorch weight (i.e. y @ w.T)
    h = jax.lax.dot_general(y, w1, (((1,), (1,)), ((), ())),
                            preferred_element_type=jnp.float32)        # (1, Ch)
    h = jnp.maximum(h, 0.0)
    s = jax.lax.dot_general(h, w2, (((1,), (1,)), ((), ())),
                            preferred_element_type=jnp.float32)        # (1, C)
    s = jax.nn.sigmoid(s)

    # ---- scale: re-read x so the big block isn't held live across the fc ----
    scale = s.astype(o_ref.dtype)                                      # (1, C)
    o_ref[...] = x_ref[...] * scale[:, :, None]


@functools.partial(jax.jit, static_argnames=("rescale_input",))
def se_layer(x, input_mask, w1, w2, *, rescale_input):
    """x: (B, C, H, W); input_mask: (B, 1, H, W);
    w1: (C//r, C), w2: (C, C//r) — PyTorch nn.Linear weights (out, in)."""
    B, C, H, W = x.shape
    HW = H * W
    HWp = ((HW + 127) // 128) * 128            # lane-dense last dim
    pad = HWp - HW

    x_flat = x.reshape(B, C, HW)
    if pad:
        x_flat = jnp.pad(x_flat, ((0, 0), (0, 0), (0, pad)))

    operands = [x_flat]
    in_specs = [pl.BlockSpec((1, C, HWp), lambda b: (b, 0, 0))]

    if rescale_input:
        m_flat = input_mask.reshape(B, 1, HW)
        if pad:
            m_flat = jnp.pad(m_flat, ((0, 0), (0, 0), (0, pad)))
        operands.append(m_flat)
        in_specs.append(pl.BlockSpec((1, 1, HWp), lambda b: (b, 0, 0)))

    operands += [w1, w2]
    in_specs += [pl.BlockSpec(w1.shape, lambda b: (0, 0)),
                 pl.BlockSpec(w2.shape, lambda b: (0, 0))]

    kernel = functools.partial(_se_kernel, rescale_input=rescale_input, hw=HW)

    itemsize = x.dtype.itemsize
    # VMEM budget: double-buffered x + out blocks (+ mask) + weights + margin.
    block_bytes = C * HWp * itemsize
    mask_blk_bytes = HWp * input_mask.dtype.itemsize if rescale_input else 0
    weight_bytes = w1.size * w1.dtype.itemsize + w2.size * w2.dtype.itemsize
    need = 2 * (2 * block_bytes + mask_blk_bytes) + 2 * weight_bytes + (4 << 20)
    vmem_limit = int(min(max(need, 32 << 20), 64 << 20))

    Ch = w1.shape[0]
    cost = pl.CostEstimate(
        flops=int(2 * B * C * HWp + 4 * B * C * Ch),
        transcendentals=int(B * C),
        bytes_accessed=int(2 * B * C * HWp * itemsize
                           + B * mask_blk_bytes + weight_bytes),
    )

    out_flat = pl.pallas_call(
        kernel,
        out_shape=jax.ShapeDtypeStruct((B, C, HWp), x.dtype),
        grid=(B,),
        in_specs=in_specs,
        out_specs=pl.BlockSpec((1, C, HWp), lambda b: (b, 0, 0)),
        compiler_params=pltpu.CompilerParams(
            dimension_semantics=("parallel",),
            vmem_limit_bytes=vmem_limit),
        cost_estimate=cost,
    )(*operands)

    if pad:
        out_flat = out_flat[:, :, :HW]
    return out_flat.reshape(B, C, H, W)


def se_layer_ref(x, input_mask, w1, w2, *, rescale_input):
    """Pure-JAX reference mirroring the PyTorch forward."""
    B, C, H, W = x.shape
    if rescale_input:
        y = x.reshape(B, C, -1).sum(-1) / input_mask.reshape(B, 1, -1).sum(-1)
    else:
        y = x.reshape(B, C, -1).mean(-1)
    h = jnp.maximum(y @ w1.T, 0.0)
    s = jax.nn.sigmoid(h @ w2.T)
    return x * s[:, :, None, None]


if __name__ == "__main__":
    key = jax.random.PRNGKey(0)
    kx, km, k1, k2 = jax.random.split(key, 4)

    B, C, H, W = 2, 32, 16, 16        # HW = 256 -> already lane-dense
    reduction = 16
    Ch = C // reduction               # 2

    x = jax.random.normal(kx, (B, C, H, W), dtype=jnp.float32)
    mask = (jax.random.uniform(km, (B, 1, H, W)) > 0.3).astype(jnp.float32)
    mask = mask.at[:, :, 0, 0].set(1.0)   # guarantee nonzero denominator
    w1 = jax.random.normal(k1, (Ch, C), dtype=jnp.float32) / jnp.sqrt(C)
    w2 = jax.random.normal(k2, (C, Ch), dtype=jnp.float32) / jnp.sqrt(Ch)

    # rescale_input=True (mask-normalized squeeze)
    out = jax.block_until_ready(se_layer(x, mask, w1, w2, rescale_input=True))
    ref = se_layer_ref(x, mask, w1, w2, rescale_input=True)
    assert out.shape == (B, C, H, W)
    assert jnp.allclose(out, ref, atol=1e-5, rtol=1e-5), "rescale=True mismatch"

    # rescale_input=False (mask is never DMA'd into the kernel)
    out2 = jax.block_until_ready(se_layer(x, mask, w1, w2, rescale_input=False))
    ref2 = se_layer_ref(x, mask, w1, w2, rescale_input=False)
    assert jnp.allclose(out2, ref2, atol=1e-5, rtol=1e-5), "rescale=False mismatch"

    # non-multiple-of-128 spatial size (exercises the lane-padding path)
    xs = jax.random.normal(kx, (B, C, 8, 8), dtype=jnp.float32)
    ms = (jax.random.uniform(km, (B, 1, 8, 8)) > 0.3).astype(jnp.float32)
    ms = ms.at[:, :, 0, 0].set(1.0)
    out3 = jax.block_until_ready(se_layer(xs, ms, w1, w2, rescale_input=True))
    ref3 = se_layer_ref(xs, ms, w1, w2, rescale_input=True)
    assert jnp.allclose(out3, ref3, atol=1e-5, rtol=1e-5), "padded-HW mismatch"

    # native bf16 I/O path (reduction still accumulates in f32 in-kernel)
    xb = x.astype(jnp.bfloat16)
    out4 = jax.block_until_ready(se_layer(xb, mask, w1, w2, rescale_input=True))
    ref4 = se_layer_ref(xb.astype(jnp.float32), mask, w1, w2, rescale_input=True)
    assert out4.dtype == jnp.bfloat16
    assert jnp.allclose(out4.astype(jnp.float32), ref4, atol=5e-2, rtol=5e-2), \
        "bf16 mismatch"

    print("KERNEL_OK")
</pallas_src>

<mosaic_0001>
module attributes {stable_mosaic.version = 11 : i64} {
  func.func @_se_kernel(%arg0: i32, %arg1: memref<1x32x256xf32, #tpu.memory_space<vmem>>, %arg2: memref<1x1x256xf32, #tpu.memory_space<vmem>>, %arg3: memref<2x32xf32, #tpu.memory_space<vmem>>, %arg4: memref<32x2xf32, #tpu.memory_space<vmem>>, %arg5: memref<1x32x256xf32, #tpu.memory_space<vmem>>) attributes {dimension_semantics = [#tpu.dimension_semantics<parallel>], iteration_bounds = array<i64: 2>, scalar_prefetch = 0 : i64, scratch_operands = 0 : i64, tpu.core_type = #tpu.core_type<tc>, window_params = [{transform_indices = @transform_0, window_bounds = array<i64: 1, 32, 256>}, {transform_indices = @transform_1, window_bounds = array<i64: 1, 1, 256>}, {pipeline_mode = #tpu.pipeline_mode<synchronous>, transform_indices = @transform_2, window_bounds = array<i64: 2, 32>}, {pipeline_mode = #tpu.pipeline_mode<synchronous>, transform_indices = @transform_3, window_bounds = array<i64: 32, 2>}, {transform_indices = @transform_4, window_bounds = array<i64: 1, 32, 256>}]} {
    %c0 = arith.constant 0 : index
    %c0_0 = arith.constant 0 : index
    %c0_1 = arith.constant 0 : index
    %0 = vector.load %arg1[%c0, %c0_0, %c0_1] : memref<1x32x256xf32, #tpu.memory_space<vmem>>, vector<1x32x256xf32>
    %cst = arith.constant dense<0.000000e+00> : vector<1x32xf32>
    %1 = vector.multi_reduction <add>, %0, %cst [2] : vector<1x32x256xf32> to vector<1x32xf32>
    %c0_2 = arith.constant 0 : index
    %c0_3 = arith.constant 0 : index
    %c0_4 = arith.constant 0 : index
    %2 = vector.load %arg2[%c0_2, %c0_3, %c0_4] : memref<1x1x256xf32, #tpu.memory_space<vmem>>, vector<1x1x256xf32>
    %cst_5 = arith.constant dense<0.000000e+00> : vector<1x1xf32>
    %3 = vector.multi_reduction <add>, %2, %cst_5 [2] : vector<1x1x256xf32> to vector<1x1xf32>
    %4 = vector.broadcast %3 : vector<1x1xf32> to vector<1x32xf32>
    %5 = arith.divf %1, %4 : vector<1x32xf32>
    %c0_6 = arith.constant 0 : index
    %c0_7 = arith.constant 0 : index
    %6 = vector.load %arg3[%c0_6, %c0_7] : memref<2x32xf32, #tpu.memory_space<vmem>>, vector<2x32xf32>
    %c0_8 = arith.constant 0 : index
    %c0_9 = arith.constant 0 : index
    %7 = vector.load %arg4[%c0_8, %c0_9] : memref<32x2xf32, #tpu.memory_space<vmem>>, vector<32x2xf32>
    %cst_10 = arith.constant dense<0.000000e+00> : vector<1x2xf32>
    %8 = tpu.matmul %5, %6, %cst_10 {dimension_numbers = #tpu.dot_dimension_numbers<[1], [1], [0], [0], [0, 0, 1, 0], [], []>} : vector<1x32xf32>, vector<2x32xf32>, vector<1x2xf32> -> vector<1x2xf32>
    %cst_11 = arith.constant 0.000000e+00 : f32
    %9 = vector.broadcast %cst_11 : f32 to vector<1x2xf32>
    %10 = arith.maximumf %8, %9 : vector<1x2xf32>
    %cst_12 = arith.constant dense<0.000000e+00> : vector<1x32xf32>
    %11 = tpu.matmul %10, %7, %cst_12 {dimension_numbers = #tpu.dot_dimension_numbers<[1], [1], [0], [0], [0, 0, 1, 0], [], []>} : vector<1x2xf32>, vector<32x2xf32>, vector<1x32xf32> -> vector<1x32xf32>
    %12 = arith.negf %11 : vector<1x32xf32>
    %13 = math.exp %12 : vector<1x32xf32>
    %cst_13 = arith.constant 1.000000e+00 : f32
    %14 = vector.broadcast %cst_13 : f32 to vector<1x32xf32>
    %15 = arith.addf %14, %13 : vector<1x32xf32>
    %16 = arith.divf %14, %15 : vector<1x32xf32>
    %c0_14 = arith.constant 0 : index
    %c0_15 = arith.constant 0 : index
    %c0_16 = arith.constant 0 : index
    %17 = vector.load %arg1[%c0_14, %c0_15, %c0_16] : memref<1x32x256xf32, #tpu.memory_space<vmem>>, vector<1x32x256xf32>
    %18 = vector.shape_cast %16 : vector<1x32xf32> to vector<1x32x1xf32>
    %19 = vector.broadcast %18 : vector<1x32x1xf32> to vector<1x32x256xf32>
    %20 = arith.mulf %17, %19 : vector<1x32x256xf32>
    %c0_17 = arith.constant 0 : index
    %c0_18 = arith.constant 0 : index
    %c0_19 = arith.constant 0 : index
    %21 = vector.load %arg5[%c0_17, %c0_18, %c0_19] : memref<1x32x256xf32, #tpu.memory_space<vmem>>, vector<1x32x256xf32>
    tpu.vector_store %arg5[%c0_17, %c0_18, %c0_19], %20 {strides = array<i32>} : memref<1x32x256xf32, #tpu.memory_space<vmem>>, vector<1x32x256xf32>,
    return
  }
  func.func @transform_0(%arg0: i32) -> (i32, i32, i32) {
    %c0_i32 = arith.constant 0 : i32
    %c0_i32_0 = arith.constant 0 : i32
    %c0_i32_1 = arith.constant 0 : i32
    return %arg0, %c0_i32, %c0_i32_0 : i32, i32, i32
  }
  func.func @transform_1(%arg0: i32) -> (i32, i32, i32) {
    %c0_i32 = arith.constant 0 : i32
    %c0_i32_0 = arith.constant 0 : i32
    %c0_i32_1 = arith.constant 0 : i32
    return %arg0, %c0_i32, %c0_i32_0 : i32, i32, i32
  }
  func.func @transform_2(%arg0: i32) -> (i32, i32) {
    %c0_i32 = arith.constant 0 : i32
    %c0_i32_0 = arith.constant 0 : i32
    %c0_i32_1 = arith.constant 0 : i32
    return %c0_i32, %c0_i32_0 : i32, i32
  }
  func.func @transform_3(%arg0: i32) -> (i32, i32) {
    %c0_i32 = arith.constant 0 : i32
    %c0_i32_0 = arith.constant 0 : i32
    %c0_i32_1 = arith.constant 0 : i32
    return %c0_i32, %c0_i32_0 : i32, i32
  }
  func.func @transform_4(%arg0: i32) -> (i32, i32, i32) {
    %c0_i32 = arith.constant 0 : i32
    %c0_i32_0 = arith.constant 0 : i32
    %c0_i32_1 = arith.constant 0 : i32
    return %arg0, %c0_i32, %c0_i32_0 : i32, i32, i32
  }
}

</mosaic_0001>

<bundles_post_ra>
// kernel: se_layer.1
= control target key start
LH: loop header
LB: loop body
LE: loop exit
PB: predicated region body
PF: predicated region fallthrough
CT: control target
= control target key end

     0   :  { %s693_s15 = smov 0   ;;  %s788_s0 = inlined_call_operand.vmem [shape: f32[2,32,256], index: 0, kind: input, shape index: {}]   ;;  %s789_s1 = inlined_call_operand.vmem [shape: f32[2,1,256], index: 1, kind: input, shape index: {}]   ;;  %s790_s2 = inlined_call_operand.vmem [shape: f32[2,32], index: 2, kind: input, shape index: {}]   ;;  %s791_s3 = inlined_call_operand.vmem [shape: f32[32,2], index: 3, kind: input, shape index: {}]   ;;  %s792_s4 = inlined_call_operand.vmem [shape: f32[2,32,256], index: 4, kind: output, shape index: {}]  }
   0x1 LB: > { %s583_s16 = sadd.s32 4294967295, %s662_s15   ;;  %p587_p0 = scmp.ge.s32.totalorder %s662_s15, 1  ;;  %s662_s15 = sphi %s693_s15, %s14_s15  }
   0x2   : > { %p171_p1 = scmp.lt.s32.totalorder %s662_s15, 3 }
   0x4   : > { %p172_p2 = pnand %p587_p0, %p171_p1 }
   0x5   : > { %p201_p3 = scmp.lt.s32.totalorder (!%p172_p2), %s583_s16, 1  ;;  %v237_v0 = vlaneseq (!%p172_p2)  ;;  %vm247_vm0 = vcmask (!%p172_p2), 1040384   ;;  %v664_v22 = vmov (!%p172_p2), 0   ;;  %v665_v34 = vmov (!%p172_p2), 0.0   ;;  %v264_v35 = vld [vmem:[%s790_s2] sm:$0x3] (!%p172_p2) }
   0x6   : > { %175 = sbr.rel (%p172_p2) target bundleno = 902 (0x386), region = 36  ;;  %649 = vset.pattern.permute.xlu0 (!%p172_p2), %v664_v22  ;;  %648 = vset.pattern.permute.xlu1 (!%p172_p2), %v664_v22  ;;  %vm312_vm1 = vcmask (!%p172_p2), 261120   ;;  %vm666_vm2 = vmmov (!%p172_p2), 0   ;;  %v265_v36 = vld [vmem:[%s791_s3] sm:$0xff] (!%p172_p2)  ;;  %v266_v37 = vld [vmem:[%s791_s3 + $0x8] sm:$0xff] (!%p172_p2)  ;;  %vm389_vm3 = vcmask (!%p172_p2), 15360  }
   0x7   : > { %v704_v1 = vshrl.u32 (!%p172_p2), %v237_v0, 7  ;;  %612 = vmatprep.subr.mxu0 (!%p172_p2), %v665_v34  ;;  %614 = vmatprep.mubr.msk.f32.mxu0 (!%p172_p2), %vm666_vm2, %v665_v34  ;;  %v667_v38 = vmov (!%p172_p2), 0.0|0.0   ;;  %v629_v39 = vpack.c.bf16 (!%p172_p2), %v266_v37, %v265_v36  ;;  %vm630_vm4 = vmpackc.low (!%p172_p2), %vm389_vm3, %vm389_vm3  ;;  %v267_v40 = vld [vmem:[%s791_s3 + $0x10] sm:$0xff] (!%p172_p2)  ;;  %v268_v41 = vld [vmem:[%s791_s3 + $0x18] sm:$0xff] (!%p172_p2)  ;;  %v286_v43 = vand.u32 (!%p172_p2), 127, %v237_v0 }
   0x8   : > { %613 = vmatpush3.xpose.msk.msra.mxu0 (!%p172_p2), %vm312_vm1, %v264_v35  ;;  %625 = vmatprep.mubr.msk.f32.mxu1 (!%p172_p2), %vm666_vm2, %v665_v34  ;;  %v633_v42 = vpack.c.bf16 (!%p172_p2), %v268_v41, %v267_v40  ;;  %vm296_vm5 = vcmask (!%p172_p2), 130112   ;;  %vm303_vm6 = vcmask (!%p172_p2), 195712   ;;  %vm310_vm7 = vcmask (!%p172_p2), 261312  }
   0x9   : > { %v708_v2 = vsub.s32 (!%p172_p2), 0, %v704_v1  ;;  %v243_v3 = vsub.s32 (!%p172_p2), 1, %v704_v1  ;;  %628 = vmatprep.subr.bf16.mxu1 (!%p172_p2), %v667_v38  ;;  %v291_v44 = vadd.s32 (!%p172_p2), 4294967288, %v286_v43  ;;  %v298_v45 = vadd.s32 (!%p172_p2), 4294967280, %v286_v43 }
   0xa   : > { %631 = vmatpush3.bf16.xpose.msk.msra.mxu1 (!%p172_p2), %vm630_vm4, %v629_v39  ;;  %v289_v47 = vsub.s32 (!%p172_p2), %v286_v43, %v704_v1  ;;  %v305_v49 = vadd.s32 (!%p172_p2), 4294967272, %v286_v43 }
   0xb   : > { %632 = vmatprep.subr.bf16.mxu1 (!%p172_p2), %v667_v38  ;;  %v294_v48 = vsub.s32 (!%p172_p2), %v291_v44, %v704_v1  ;;  %v301_v51 = vsub.s32 (!%p172_p2), %v298_v45, %v704_v1 }
   0xc   : > { %v308_v55 = vsub.s32 (!%p172_p2), %v305_v49, %v704_v1 }
   0xd   : > { %s794_s16 = smov (!%p201_p3, %s583_s16), 1 }
   0xe   : > { %s590_s17 = sshll.u32 %s794_s16, 1  ;;  %s603_s18 = sshll.u32 %s794_s16, 6 }
   0xf   : > { %s209_s21 = scalar_lea.vmem %s789_s1, %s590_s17  ;;  %s205_s24 = scalar_lea.vmem %s788_s0, %s603_s18 }
  0x10   : > { %v235_v4 = vld [vmem:[%s209_s21] sm:$0x3]  ;;  %v720_v5 = vld [vmem:[%s205_s24 + $0x10] sm:$0xff]  ;;  %v722_v6 = vld [vmem:[%s205_s24 + $0x18] sm:$0xff]  ;;  %s214_s11 = scalar_lea.vmem %s792_s4, %s603_s18 }
  0x11   : > { %v240_v7 = vrot.slane %v235_v4, %v708_v2  ;;  %v244_v8 = vrot.slane %v235_v4, %v243_v3  ;;  %v226_v9 = vadd.f32 %v722_v6, %v720_v5  ;;  %v727_v10 = vld [vmem:[%s205_s24 + $0x20] sm:$0xff]  ;;  %v729_v11 = vld [vmem:[%s205_s24 + $0x28] sm:$0xff]  ;;  %v739_v19 = vld [vmem:[%s205_s24 + $0x30] sm:$0xff] }
  0x12   : > { %v731_v14 = vld [vmem:[%s205_s24] sm:$0xff]  ;;  %v733_v15 = vld [vmem:[%s205_s24 + $0x8] sm:$0xff]  ;;  %v229_v16 = vadd.f32 %v729_v11, %v727_v10  ;;  %v741_v20 = vld [vmem:[%s205_s24 + $0x38] sm:$0xff]  ;;  %635 = vmatpush3.bf16.xpose.msk.msra.mxu1 %vm630_vm4, %v633_v42 }
  0x13   : > { %v248_v12 = vsel %vm247_vm0, %v240_v7, 0.0  ;;  %v249_v13 = vsel %vm247_vm0, %v244_v8, 0.0  ;;  %227 = vadd.xlane.f32.xlu1 %v226_v9  ;;  %v223_v18 = vadd.f32 %v733_v15, %v731_v14  ;;  %v232_v21 = vadd.f32 %v741_v20, %v739_v19 }
  0x14   : > { %v250_v17 = vadd.f32 %v249_v13, %v248_v12 }
  0x16   : > { %251 = vadd.xlane.f32.xlu0 %v250_v17 }
  0x17   : > { %230 = vadd.xlane.f32.xlu1 %v229_v16 }
  0x1a   : > { %224 = vadd.xlane.f32.xlu0 %v223_v18 }
  0x1e   : > { %233 = vadd.xlane.f32.xlu0 %v232_v21 }
  0xa0   : > { %v228_v25 = vpop.xlane.xlu1 %227 }
  0xa3   : > { %v252_v23 = vpop.xlane.xlu0 %251 }
  0xa4   : > { %v257_v24 = vrot.slane %v252_v23, %v708_v2  ;;  %v231_v30 = vpop.xlane.xlu1 %230 }
  0xa6   : > { %650 = vrcp.f32 %v257_v24 }
  0xa7   : > { %v225_v27 = vpop.xlane.xlu0 %224 }
  0xab   : > { %v234_v32 = vpop.xlane.xlu0 %233 }
  0xb0   : > { %v651_v26 = vpop.eup %650 }
  0xb1   : > { %v261_v28 = vmul.f32 %v651_v26, %v228_v25  ;;  %v260_v29 = vmul.f32 %v651_v26, %v225_v27  ;;  %v262_v31 = vmul.f32 %v651_v26, %v231_v30  ;;  %v263_v33 = vmul.f32 %v651_v26, %v234_v32 }
  0xb3   : > { %277 = vperm.xlu0 %649, %v261_v28   ;;  %274 = vperm.xlu1 %648, %v260_v29  }
  0xb7   : > { %280 = vperm.xlu1 %648, %v262_v31  }
  0xbb   : > { %283 = vperm.xlu1 %648, %v263_v33  }
 0x132   : > { %v275_v46 = vpop.permute.xlu1 %274  ;;  %v278_v50 = vpop.permute.xlu0 %277 }
 0x133   : > { %v290_v53 = vrot.slane %v275_v46, %v289_v47  ;;  %v295_v54 = vrot.slane %v278_v50, %v294_v48 }
 0x135   : > { %v297_v58 = vsel %vm296_vm5, %v295_v54, %v290_v53 }
 0x136   : > { %v281_v52 = vpop.permute.xlu1 %280 }
 0x137   : > { %v302_v56 = vrot.slane %v281_v52, %v301_v51 }
 0x139   : > { %v304_v60 = vsel %vm303_vm6, %v302_v56, %v297_v58 }
 0x13a   : > { %v284_v57 = vpop.permute.xlu1 %283 }
 0x13b   : > { %v309_v59 = vrot.slane %v284_v57, %v308_v55 }
 0x13d   : > { %v311_v61 = vsel %vm310_vm7, %v309_v59, %v304_v60 }
 0x13e   : > { %615 = vmatmul.mubr.msk.f32.vlgmr.msra.gmra.mrb[0].mxu0 %vm312_vm1, %v311_v61 }
 0x211   : > { %v384_v62 = vpop.f32.mrb[0].mxu0 }
 0x212   : > { %v388_v63 = vmax.f32 %v384_v62, 0.0  ;;  %v616_v0 = vpop.f32.mrb[1].mxu0 }
 0x214   : > { %626 = vmatmul.mubr.msk.f32.vlgmr.msra.gmra.mrb[0].mxu1 %vm389_vm3, %v388_v63 }
 0x2e7   : > { %v471_v3 = vpop.f32.mrb[0].mxu1 }
 0x2e8   : > { %v600_v4 = vmul.f32 -1.442695, %v471_v3  ;;  %v627_v1 = vpop.f32.mrb[1].mxu1 }
 0x2ea   : > { %652 = vpow2.f32 %v600_v4 }
 0x2f4   : > { %v653_v7 = vpop.eup %652 }
 0x2f5   : > { %v478_v8 = vadd.f32 1.0, %v653_v7 }
 0x2f7   : > { %654 = vrcp.f32 %v478_v8 }
 0x301   : > { %v655_v9 = vpop.eup %654 }
 0x302   : > { %v484_v12 = vrot.slane %v655_v9, %v708_v2 }
 0x304   : > { %486 = vbcast.lane.b32.xlu1 %v484_v12, 256 }
 0x308   : > { %490 = vbcast.lane.b32.xlu1 %v484_v12, 264 }
 0x30c   : > { %494 = vbcast.lane.b32.xlu1 %v484_v12, 272 }
 0x310   : > { %498 = vbcast.lane.b32.xlu1 %v484_v12, 280 }
 0x376   : > { %v487_v13 = vpop.permute.xlu1 %486 }
 0x377   : > { %v500_v16 = vmul.f32 %v487_v13, %v731_v14  ;;  %v501_v17 = vmul.f32 %v487_v13, %v733_v15 }
 0x379   : > { %508 = vst [vmem:[%s214_s11] sm:$0xff] %v500_v16  ;;  %509 = vst [vmem:[%s214_s11 + $0x8] sm:$0xff] %v501_v17 }
 0x37a   : > { %v491_v18 = vpop.permute.xlu1 %490 }
 0x37b   : > { %v502_v21 = vmul.f32 %v491_v18, %v720_v5  ;;  %v503_v2 = vmul.f32 %v491_v18, %v722_v6 }
 0x37d   : > { %510 = vst [vmem:[%s214_s11 + $0x10] sm:$0xff] %v502_v21  ;;  %511 = vst [vmem:[%s214_s11 + $0x18] sm:$0xff] %v503_v2 }
 0x37e   : > { %v495_v22 = vpop.permute.xlu1 %494 }
 0x37f   : > { %v504_v23 = vmul.f32 %v495_v22, %v727_v10  ;;  %v505_v24 = vmul.f32 %v495_v22, %v729_v11 }
 0x381   : > { %512 = vst [vmem:[%s214_s11 + $0x20] sm:$0xff] %v504_v23  ;;  %513 = vst [vmem:[%s214_s11 + $0x28] sm:$0xff] %v505_v24 }
 0x382   : > { %v499_v25 = vpop.permute.xlu1 %498 }
 0x383   : > { %v506_v14 = vmul.f32 %v499_v25, %v739_v19  ;;  %v507_v15 = vmul.f32 %v499_v25, %v741_v20 }
 0x385   : > { %514 = vst [vmem:[%s214_s11 + $0x30] sm:$0xff] %v506_v14  ;;  %515 = vst [vmem:[%s214_s11 + $0x38] sm:$0xff] %v507_v15 }
 0x386 PF: > { %s14_s15 = sadd.s32 1, %s662_s15  }
 0x387   : > { %p11_p4 = scmp.ge.s32.totalorder %s14_s15, 4  }
 0x389   :  { %13 = sbr.rel (!%p11_p4) target bundleno = 1 (0x1), region = 69 }

</bundles_post_ra>
